<compile_context>
chip_gen: v7x
topology: tpu7x:2x2x1
jax: 0.10.0
libtpu: 0.0.40
codegen_flags: <defaults>
</compile_context>

<pallas_src>
import jax
import jax.numpy as jnp
from jax.experimental import pallas as pl
from jax.experimental.pallas import tpu as pltpu

CHANNEL1 = 16
CHANNEL2 = 24          # must be 24: conv2.view(24, size*size)
DIM1 = 32
H = W = 64
SIZE = 2               # spatial size after layer2 (== `size` in the torch code)
BN_EPS = 1e-5
LANES = 128
NEG_PAD = -1e30        # pre-softmax fill for padded logit lanes (kept in f32)

# row offsets of the packed bf16 weight slab (all multiples of 16 for bf16 packing)
_W1_R, _W2_R, _W4_R, _W3_R = 0, 48, 112, 144
WSLAB_ROWS = 176


# ------------------------------ Pallas kernel ------------------------------

def fused_classify_kernel(p_ref, w_ref, vec_ref, o_ref):
    vec = vec_ref[...]                               # (8,128) f32 packed vectors
    gamma = vec[0:1, 0:CHANNEL1]
    beta = vec[1:2, 0:CHANNEL1]
    b2 = vec[2:3, 0:CHANNEL2]
    b3 = vec[3:4, 0:DIM1]
    b4 = vec[4:5, :]                                 # (1,128), -1e30 beyond col 3

    # ---- layer1: Conv2d(3,16,4,4) as one patch matmul (bias dropped: BN cancels it)
    conv1 = jnp.dot(p_ref[...], w_ref[_W1_R:_W1_R + 48, 0:CHANNEL1],
                    preferred_element_type=jnp.float32)            # (256,16) f32
    # BatchNorm2d training-mode biased stats, one pass (sum & sum-sq in parallel)
    inv_n = 1.0 / conv1.shape[0]
    mean = jnp.sum(conv1, axis=0, keepdims=True) * inv_n
    ex2 = jnp.sum(conv1 * conv1, axis=0, keepdims=True) * inv_n
    var = jnp.maximum(ex2 - mean * mean, 0.0)
    act1 = jnp.maximum(
        (conv1 - mean) * jax.lax.rsqrt(var + BN_EPS) * gamma + beta, 0.0)
    # MaxPool2d(2,2): rows are (dh, dw, kh, kw, dh2, dw2, qh, qw) -> contiguous halves
    t1 = jnp.maximum(act1[0:128], act1[128:256])
    pool1 = jnp.maximum(t1[0:64], t1[64:128]).astype(jnp.bfloat16)  # (64,16)

    # ---- layer2: Conv2d(16,24,2,2) as 4 independent tap matmuls, tree-summed
    w2 = w_ref[_W2_R:_W2_R + 64, 0:CHANNEL2]                        # (64,24) bf16
    d0 = jnp.dot(pool1[0:16], w2[0:16], preferred_element_type=jnp.float32)
    d1 = jnp.dot(pool1[16:32], w2[16:32], preferred_element_type=jnp.float32)
    d2 = jnp.dot(pool1[32:48], w2[32:48], preferred_element_type=jnp.float32)
    d3 = jnp.dot(pool1[48:64], w2[48:64], preferred_element_type=jnp.float32)
    act2 = jnp.maximum((d0 + d1) + (d2 + d3) + b2, 0.0)             # (16,24)
    # MaxPool2d(2,2): rows are (dh2, dw2, qh, qw) -> contiguous halves
    t2 = jnp.maximum(act2[0:8], act2[8:16])
    pool2 = jnp.maximum(t2[0:4], t2[4:8])                           # (4,24), row=qh*2+qw
    # pool2 IS squeeze(0).view(24, size*size).permute(1, 0) of the torch code.
    # Duplicate to 8 rows so layers 3/4 and the final store are full-sublane/tile.
    pool2_8 = jnp.concatenate([pool2, pool2], axis=0).astype(jnp.bfloat16)  # (8,24)

    # ---- layer3 (Linear 24->32 + ReLU), layer4 (Linear 32->3), log_softmax
    hid = jnp.maximum(
        jnp.dot(pool2_8, w_ref[_W3_R:_W3_R + 24, 0:DIM1],
                preferred_element_type=jnp.float32) + b3, 0.0)      # (8,32) f32
    logits = jnp.dot(hid.astype(jnp.bfloat16), w_ref[_W4_R:_W4_R + 32, :],
                     preferred_element_type=jnp.float32) + b4       # (8,128) f32
    m = jnp.max(logits, axis=1, keepdims=True)       # padded lanes sit at -1e30
    s = logits - m
    lse = jnp.log(jnp.sum(jnp.exp(s), axis=1, keepdims=True))
    o_ref[...] = s - lse                             # (8,128) full-tile unmasked store


# ------------------------------ glue (JAX) --------------------------------

def _full_spec(shape):
    # whole-array block, single grid step
    return pl.BlockSpec(shape, lambda i: (0,) * len(shape))


def im2col_layer1(x):
    """(1,3,64,64) NCHW -> (256,48) bf16 patch matrix with rows ordered
    (dh, dw, kh, kw, dh2, dw2, qh, qw) and cols (c, ph, pw), so every pooling /
    conv2-tap stage in the kernel operates on contiguous row halves / slices.
    Two rank<=8 transposes (h16 = qh*8+dh2*4+kh*2+dh, w16 likewise)."""
    x0 = x[0].astype(jnp.bfloat16)                        # (3,64,64), bf16 halves traffic
    # step 1: classic im2col, rows (dh, dw, h8, w8)
    xr = x0.reshape(3, 8, 2, 4, 8, 2, 4)                  # (c, h8, dh, ph, w8, dw, pw)
    xt = jnp.transpose(xr, (2, 5, 1, 4, 0, 3, 6))         # (dh, dw, h8, w8, c, ph, pw)
    p = xt.reshape(4, 64, 48)                             # ((dh,dw), (h8,w8), (c,ph,pw))
    # step 2: (h8,w8) = (qh,dh2,kh, qw,dw2,kw)  ->  (kh, kw, dh2, dw2, qh, qw)
    p = p.reshape(4, 2, 2, 2, 2, 2, 2, 48)                # (a, qh, dh2, kh, qw, dw2, kw, col)
    p = jnp.transpose(p, (0, 3, 6, 2, 5, 1, 4, 7))        # (a, kh, kw, dh2, dw2, qh, qw, col)
    return p.reshape(256, 48)


def init_params(key):
    ks = jax.random.split(key, 8)
    return {
        # torch-shaped parameters
        "w1": jax.random.normal(ks[0], (CHANNEL1, 3, 4, 4), jnp.float32) * 0.1,
        "b1": jax.random.normal(ks[1], (CHANNEL1,), jnp.float32) * 0.1,
        "gamma": jnp.ones((CHANNEL1,), jnp.float32),
        "beta": jnp.zeros((CHANNEL1,), jnp.float32),
        "w2": jax.random.normal(ks[2], (CHANNEL2, CHANNEL1, 2, 2), jnp.float32) * 0.1,
        "b2": jax.random.normal(ks[3], (CHANNEL2,), jnp.float32) * 0.1,
        "w3": jax.random.normal(ks[4], (DIM1, CHANNEL2), jnp.float32) * 0.1,
        "b3": jax.random.normal(ks[5], (DIM1,), jnp.float32) * 0.1,
        "w4": jax.random.normal(ks[6], (3, DIM1), jnp.float32) * 0.1,
        "b4": jax.random.normal(ks[7], (3,), jnp.float32) * 0.1,
    }


def prepare_params(p):
    """One-time parameter re-layout: a single bf16 (176,128) weight slab plus a
    single f32 (8,128) bias/scale slab (kernel therefore has only 3 inputs)."""
    w1_mat = p["w1"].reshape(CHANNEL1, 3 * 4 * 4).T                      # (48,16)
    # conv2 weight laid out so row block k = kh*2+kw matches the k-th 16-row
    # slice of pool1: row = kh*32 + kw*16 + c.
    w2_mat = jnp.transpose(p["w2"], (2, 3, 1, 0)).reshape(4 * CHANNEL1, CHANNEL2)
    w3_mat = p["w3"].T                                                   # (24,32)
    w4_mat = jnp.zeros((DIM1, LANES), jnp.float32).at[:, :3].set(p["w4"].T)

    slab = jnp.zeros((WSLAB_ROWS, LANES), jnp.float32)
    slab = slab.at[_W1_R:_W1_R + 48, 0:CHANNEL1].set(w1_mat)
    slab = slab.at[_W2_R:_W2_R + 64, 0:CHANNEL2].set(w2_mat)
    slab = slab.at[_W4_R:_W4_R + 32, :].set(w4_mat)
    slab = slab.at[_W3_R:_W3_R + 24, 0:DIM1].set(w3_mat)

    vec = jnp.zeros((8, LANES), jnp.float32)
    vec = vec.at[0, :CHANNEL1].set(p["gamma"])
    vec = vec.at[1, :CHANNEL1].set(p["beta"])
    vec = vec.at[2, :CHANNEL2].set(p["b2"])
    vec = vec.at[3, :DIM1].set(p["b3"])
    vec = vec.at[4, :].set(NEG_PAD)
    vec = vec.at[4, :3].set(p["b4"])
    # NOTE: p["b1"] is intentionally unused — the conv1 bias is exactly
    # cancelled by the BatchNorm mean subtraction.
    return {"wslab": slab.astype(jnp.bfloat16), "vec": vec}


@jax.jit
def classify_forward(x, prep):
    patches = im2col_layer1(x)                                    # (256,48) bf16
    ins = (patches, prep["wslab"], prep["vec"])
    logp_pad = pl.pallas_call(
        fused_classify_kernel,
        out_shape=jax.ShapeDtypeStruct((8, LANES), jnp.float32),
        grid=(1,),
        in_specs=[_full_spec(a.shape) for a in ins],
        out_specs=_full_spec((8, LANES)),
        compiler_params=pltpu.CompilerParams(dimension_semantics=("arbitrary",)),
    )(*ins)
    return logp_pad[:SIZE * SIZE, :3]                             # (4,3) log-probs


# ------------------------- pure-JAX reference (check) ----------------------

def reference_forward(x, p):
    y = jax.lax.conv_general_dilated(x, p["w1"], (4, 4), "VALID",
                                     dimension_numbers=("NCHW", "OIHW", "NCHW"))
    y = y + p["b1"].reshape(1, CHANNEL1, 1, 1)
    mean = jnp.mean(y, axis=(0, 2, 3), keepdims=True)
    var = jnp.mean(jnp.square(y - mean), axis=(0, 2, 3), keepdims=True)
    y = (y - mean) * jax.lax.rsqrt(var + BN_EPS)
    y = y * p["gamma"].reshape(1, -1, 1, 1) + p["beta"].reshape(1, -1, 1, 1)
    y = jnp.maximum(y, 0.0)
    y = jax.lax.reduce_window(y, -jnp.inf, jax.lax.max, (1, 1, 2, 2), (1, 1, 2, 2), "VALID")
    y = jax.lax.conv_general_dilated(y, p["w2"], (2, 2), "VALID",
                                     dimension_numbers=("NCHW", "OIHW", "NCHW"))
    y = y + p["b2"].reshape(1, CHANNEL2, 1, 1)
    y = jnp.maximum(y, 0.0)
    y = jax.lax.reduce_window(y, -jnp.inf, jax.lax.max, (1, 1, 2, 2), (1, 1, 2, 2), "VALID")
    y = y[0].reshape(CHANNEL2, SIZE * SIZE).T                     # (4,24)
    y = jnp.maximum(y @ p["w3"].T + p["b3"], 0.0)
    y = y @ p["w4"].T + p["b4"]
    return jax.nn.log_softmax(y, axis=1)


if __name__ == "__main__":
    key = jax.random.PRNGKey(0)
    kx, kp = jax.random.split(key)
    x = jax.random.normal(kx, (1, 3, H, W), jnp.float32)   # batch pinned to 1
    params = init_params(kp)
    prep = prepare_params(params)          # one-time parameter re-layout

    out = jax.block_until_ready(classify_forward(x, prep))

    assert out.shape == (SIZE * SIZE, 3), out.shape
    assert bool(jnp.all(jnp.isfinite(out)))
    # log_softmax rows must sum to ~1 in prob space (softmax math is f32)
    assert bool(jnp.allclose(jnp.sum(jnp.exp(out), axis=1), 1.0, atol=1e-4))
    # match the pure-JAX f32 reference of the torch forward; bf16 MXU operands
    # (with f32 accumulation + f32 elementwise/softmax) => relaxed tolerance.
    ref = reference_forward(x, params)
    assert bool(jnp.allclose(out, ref, atol=2e-2, rtol=2e-2)), \
        float(jnp.max(jnp.abs(out - ref)))
    print("KERNEL_OK")
</pallas_src>

<mosaic_0001>
module attributes {stable_mosaic.version = 11 : i64} {
  func.func @fused_classify_kernel(%arg0: i32, %arg1: memref<256x48xbf16, #tpu.memory_space<vmem>>, %arg2: memref<176x128xbf16, #tpu.memory_space<vmem>>, %arg3: memref<8x128xf32, #tpu.memory_space<vmem>>, %arg4: memref<8x128xf32, #tpu.memory_space<vmem>>) attributes {dimension_semantics = [#tpu.dimension_semantics<arbitrary>], iteration_bounds = array<i64: 1>, scalar_prefetch = 0 : i64, scratch_operands = 0 : i64, tpu.core_type = #tpu.core_type<tc>, window_params = [{pipeline_mode = #tpu.pipeline_mode<synchronous>, transform_indices = @transform_0, window_bounds = array<i64: 256, 48>}, {pipeline_mode = #tpu.pipeline_mode<synchronous>, transform_indices = @transform_1, window_bounds = array<i64: 176, 128>}, {pipeline_mode = #tpu.pipeline_mode<synchronous>, transform_indices = @transform_2, window_bounds = array<i64: 8, 128>}, {pipeline_mode = #tpu.pipeline_mode<synchronous>, transform_indices = @transform_3, window_bounds = array<i64: 8, 128>}]} {
    %c0 = arith.constant 0 : index
    %c0_0 = arith.constant 0 : index
    %0 = vector.load %arg3[%c0, %c0_0] : memref<8x128xf32, #tpu.memory_space<vmem>>, vector<8x128xf32>
    %1 = vector.extract_strided_slice %0 {offsets = [0, 0], sizes = [1, 16], strides = [1, 1]} : vector<8x128xf32> to vector<1x16xf32>
    %2 = vector.extract_strided_slice %0 {offsets = [1, 0], sizes = [1, 16], strides = [1, 1]} : vector<8x128xf32> to vector<1x16xf32>
    %3 = vector.extract_strided_slice %0 {offsets = [2, 0], sizes = [1, 24], strides = [1, 1]} : vector<8x128xf32> to vector<1x24xf32>
    %4 = vector.extract_strided_slice %0 {offsets = [3, 0], sizes = [1, 32], strides = [1, 1]} : vector<8x128xf32> to vector<1x32xf32>
    %5 = vector.extract_strided_slice %0 {offsets = [4, 0], sizes = [1, 128], strides = [1, 1]} : vector<8x128xf32> to vector<1x128xf32>
    %c0_1 = arith.constant 0 : index
    %c0_2 = arith.constant 0 : index
    %6 = vector.load %arg1[%c0_1, %c0_2] : memref<256x48xbf16, #tpu.memory_space<vmem>>, vector<256x48xbf16>
    %c0_3 = arith.constant 0 : index
    %c0_4 = arith.constant 0 : index
    %7 = vector.load %arg2[%c0_3, %c0_4] : memref<176x128xbf16, #tpu.memory_space<vmem>>, vector<48x16xbf16>
    %cst = arith.constant dense<0.000000e+00> : vector<256x16xf32>
    %8 = tpu.matmul %6, %7, %cst {dimension_numbers = #tpu.dot_dimension_numbers<[1], [0], [0], [1], [0, 0, 1, 1], [], []>} : vector<256x48xbf16>, vector<48x16xbf16>, vector<256x16xf32> -> vector<256x16xf32>
    %cst_5 = arith.constant dense<0.000000e+00> : vector<16xf32>
    %9 = vector.multi_reduction <add>, %8, %cst_5 [0] : vector<256x16xf32> to vector<16xf32>
    %10 = vector.shape_cast %9 : vector<16xf32> to vector<1x16xf32>
    %cst_6 = arith.constant 3.906250e-03 : f32
    %11 = vector.broadcast %cst_6 : f32 to vector<1x16xf32>
    %12 = arith.mulf %10, %11 : vector<1x16xf32>
    %13 = arith.mulf %8, %8 : vector<256x16xf32>
    %cst_7 = arith.constant dense<0.000000e+00> : vector<16xf32>
    %14 = vector.multi_reduction <add>, %13, %cst_7 [0] : vector<256x16xf32> to vector<16xf32>
    %15 = vector.shape_cast %14 : vector<16xf32> to vector<1x16xf32>
    %cst_8 = arith.constant 3.906250e-03 : f32
    %16 = vector.broadcast %cst_8 : f32 to vector<1x16xf32>
    %17 = arith.mulf %15, %16 : vector<1x16xf32>
    %18 = arith.mulf %12, %12 : vector<1x16xf32>
    %19 = arith.subf %17, %18 : vector<1x16xf32>
    %cst_9 = arith.constant 0.000000e+00 : f32
    %20 = vector.broadcast %cst_9 : f32 to vector<1x16xf32>
    %21 = arith.maximumf %19, %20 : vector<1x16xf32>
    %22 = vector.broadcast %12 : vector<1x16xf32> to vector<256x16xf32>
    %23 = arith.subf %8, %22 : vector<256x16xf32>
    %cst_10 = arith.constant 9.99999974E-6 : f32
    %24 = vector.broadcast %cst_10 : f32 to vector<1x16xf32>
    %25 = arith.addf %21, %24 : vector<1x16xf32>
    %26 = math.rsqrt %25 : vector<1x16xf32>
    %27 = vector.broadcast %26 : vector<1x16xf32> to vector<256x16xf32>
    %28 = arith.mulf %23, %27 : vector<256x16xf32>
    %29 = vector.broadcast %1 : vector<1x16xf32> to vector<256x16xf32>
    %30 = arith.mulf %28, %29 : vector<256x16xf32>
    %31 = vector.broadcast %2 : vector<1x16xf32> to vector<256x16xf32>
    %32 = arith.addf %30, %31 : vector<256x16xf32>
    %cst_11 = arith.constant 0.000000e+00 : f32
    %33 = vector.broadcast %cst_11 : f32 to vector<256x16xf32>
    %34 = arith.maximumf %32, %33 : vector<256x16xf32>
    %35 = vector.extract_strided_slice %34 {offsets = [0, 0], sizes = [128, 16], strides = [1, 1]} : vector<256x16xf32> to vector<128x16xf32>
    %36 = vector.extract_strided_slice %34 {offsets = [128, 0], sizes = [128, 16], strides = [1, 1]} : vector<256x16xf32> to vector<128x16xf32>
    %37 = arith.maximumf %35, %36 : vector<128x16xf32>
    %38 = vector.extract_strided_slice %37 {offsets = [0, 0], sizes = [64, 16], strides = [1, 1]} : vector<128x16xf32> to vector<64x16xf32>
    %39 = vector.extract_strided_slice %37 {offsets = [64, 0], sizes = [64, 16], strides = [1, 1]} : vector<128x16xf32> to vector<64x16xf32>
    %40 = arith.maximumf %38, %39 : vector<64x16xf32>
    %41 = arith.truncf %40 : vector<64x16xf32> to vector<64x16xbf16>
    %c48 = arith.constant 48 : index
    %c0_12 = arith.constant 0 : index
    %42 = vector.load %arg2[%c48, %c0_12] : memref<176x128xbf16, #tpu.memory_space<vmem>>, vector<64x24xbf16>
    %43 = vector.extract_strided_slice %41 {offsets = [0, 0], sizes = [16, 16], strides = [1, 1]} : vector<64x16xbf16> to vector<16x16xbf16>
    %44 = vector.extract_strided_slice %42 {offsets = [0, 0], sizes = [16, 24], strides = [1, 1]} : vector<64x24xbf16> to vector<16x24xbf16>
    %cst_13 = arith.constant dense<0.000000e+00> : vector<16x24xf32>
    %45 = tpu.matmul %43, %44, %cst_13 {dimension_numbers = #tpu.dot_dimension_numbers<[1], [0], [0], [1], [0, 0, 1, 1], [], []>} : vector<16x16xbf16>, vector<16x24xbf16>, vector<16x24xf32> -> vector<16x24xf32>
    %46 = vector.extract_strided_slice %41 {offsets = [16, 0], sizes = [16, 16], strides = [1, 1]} : vector<64x16xbf16> to vector<16x16xbf16>
    %47 = vector.extract_strided_slice %42 {offsets = [16, 0], sizes = [16, 24], strides = [1, 1]} : vector<64x24xbf16> to vector<16x24xbf16>
    %cst_14 = arith.constant dense<0.000000e+00> : vector<16x24xf32>
    %48 = tpu.matmul %46, %47, %cst_14 {dimension_numbers = #tpu.dot_dimension_numbers<[1], [0], [0], [1], [0, 0, 1, 1], [], []>} : vector<16x16xbf16>, vector<16x24xbf16>, vector<16x24xf32> -> vector<16x24xf32>
    %49 = vector.extract_strided_slice %41 {offsets = [32, 0], sizes = [16, 16], strides = [1, 1]} : vector<64x16xbf16> to vector<16x16xbf16>
    %50 = vector.extract_strided_slice %42 {offsets = [32, 0], sizes = [16, 24], strides = [1, 1]} : vector<64x24xbf16> to vector<16x24xbf16>
    %cst_15 = arith.constant dense<0.000000e+00> : vector<16x24xf32>
    %51 = tpu.matmul %49, %50, %cst_15 {dimension_numbers = #tpu.dot_dimension_numbers<[1], [0], [0], [1], [0, 0, 1, 1], [], []>} : vector<16x16xbf16>, vector<16x24xbf16>, vector<16x24xf32> -> vector<16x24xf32>
    %52 = vector.extract_strided_slice %41 {offsets = [48, 0], sizes = [16, 16], strides = [1, 1]} : vector<64x16xbf16> to vector<16x16xbf16>
    %53 = vector.extract_strided_slice %42 {offsets = [48, 0], sizes = [16, 24], strides = [1, 1]} : vector<64x24xbf16> to vector<16x24xbf16>
    %cst_16 = arith.constant dense<0.000000e+00> : vector<16x24xf32>
    %54 = tpu.matmul %52, %53, %cst_16 {dimension_numbers = #tpu.dot_dimension_numbers<[1], [0], [0], [1], [0, 0, 1, 1], [], []>} : vector<16x16xbf16>, vector<16x24xbf16>, vector<16x24xf32> -> vector<16x24xf32>
    %55 = arith.addf %45, %48 : vector<16x24xf32>
    %56 = arith.addf %51, %54 : vector<16x24xf32>
    %57 = arith.addf %55, %56 : vector<16x24xf32>
    %58 = vector.broadcast %3 : vector<1x24xf32> to vector<16x24xf32>
    %59 = arith.addf %57, %58 : vector<16x24xf32>
    %cst_17 = arith.constant 0.000000e+00 : f32
    %60 = vector.broadcast %cst_17 : f32 to vector<16x24xf32>
    %61 = arith.maximumf %59, %60 : vector<16x24xf32>
    %62 = vector.extract_strided_slice %61 {offsets = [0, 0], sizes = [8, 24], strides = [1, 1]} : vector<16x24xf32> to vector<8x24xf32>
    %63 = vector.extract_strided_slice %61 {offsets = [8, 0], sizes = [8, 24], strides = [1, 1]} : vector<16x24xf32> to vector<8x24xf32>
    %64 = arith.maximumf %62, %63 : vector<8x24xf32>
    %65 = vector.extract_strided_slice %64 {offsets = [0, 0], sizes = [4, 24], strides = [1, 1]} : vector<8x24xf32> to vector<4x24xf32>
    %66 = vector.extract_strided_slice %64 {offsets = [4, 0], sizes = [4, 24], strides = [1, 1]} : vector<8x24xf32> to vector<4x24xf32>
    %67 = arith.maximumf %65, %66 : vector<4x24xf32>
    %68 = tpu.concatenate %67, %67 in 0 : vector<4x24xf32>, vector<4x24xf32> -> vector<8x24xf32>
    %69 = arith.truncf %68 : vector<8x24xf32> to vector<8x24xbf16>
    %c144 = arith.constant 144 : index
    %c0_18 = arith.constant 0 : index
    %70 = vector.load %arg2[%c144, %c0_18] : memref<176x128xbf16, #tpu.memory_space<vmem>>, vector<24x32xbf16>
    %cst_19 = arith.constant dense<0.000000e+00> : vector<8x32xf32>
    %71 = tpu.matmul %69, %70, %cst_19 {dimension_numbers = #tpu.dot_dimension_numbers<[1], [0], [0], [1], [0, 0, 1, 1], [], []>} : vector<8x24xbf16>, vector<24x32xbf16>, vector<8x32xf32> -> vector<8x32xf32>
    %72 = vector.broadcast %4 : vector<1x32xf32> to vector<8x32xf32>
    %73 = arith.addf %71, %72 : vector<8x32xf32>
    %cst_20 = arith.constant 0.000000e+00 : f32
    %74 = vector.broadcast %cst_20 : f32 to vector<8x32xf32>
    %75 = arith.maximumf %73, %74 : vector<8x32xf32>
    %76 = arith.truncf %75 : vector<8x32xf32> to vector<8x32xbf16>
    %c112 = arith.constant 112 : index
    %c0_21 = arith.constant 0 : index
    %77 = vector.load %arg2[%c112, %c0_21] : memref<176x128xbf16, #tpu.memory_space<vmem>>, vector<32x128xbf16>
    %cst_22 = arith.constant dense<0.000000e+00> : vector<8x128xf32>
    %78 = tpu.matmul %76, %77, %cst_22 {dimension_numbers = #tpu.dot_dimension_numbers<[1], [0], [0], [1], [0, 0, 1, 1], [], []>} : vector<8x32xbf16>, vector<32x128xbf16>, vector<8x128xf32> -> vector<8x128xf32>
    %79 = vector.broadcast %5 : vector<1x128xf32> to vector<8x128xf32>
    %80 = arith.addf %78, %79 : vector<8x128xf32>
    %cst_23 = arith.constant dense<0xFF800000> : vector<8xf32>
    %81 = vector.multi_reduction <maximumf>, %80, %cst_23 [1] : vector<8x128xf32> to vector<8xf32>
    %82 = vector.shape_cast %81 : vector<8xf32> to vector<8x1xf32>
    %83 = vector.broadcast %82 : vector<8x1xf32> to vector<8x128xf32>
    %84 = arith.subf %80, %83 : vector<8x128xf32>
    %85 = math.exp %84 : vector<8x128xf32>
    %cst_24 = arith.constant dense<0.000000e+00> : vector<8xf32>
    %86 = vector.multi_reduction <add>, %85, %cst_24 [1] : vector<8x128xf32> to vector<8xf32>
    %87 = vector.shape_cast %86 : vector<8xf32> to vector<8x1xf32>
    %88 = math.log %87 : vector<8x1xf32>
    %89 = vector.broadcast %88 : vector<8x1xf32> to vector<8x128xf32>
    %90 = arith.subf %84, %89 : vector<8x128xf32>
    %c0_25 = arith.constant 0 : index
    %c0_26 = arith.constant 0 : index
    %91 = vector.load %arg4[%c0_25, %c0_26] : memref<8x128xf32, #tpu.memory_space<vmem>>, vector<8x128xf32>
    tpu.vector_store %arg4[%c0_25, %c0_26], %90 {strides = array<i32>} : memref<8x128xf32, #tpu.memory_space<vmem>>, vector<8x128xf32>,
    return
  }
  func.func @transform_0(%arg0: i32) -> (i32, i32) {
    %c0_i32 = arith.constant 0 : i32
    %c0_i32_0 = arith.constant 0 : i32
    %c0_i32_1 = arith.constant 0 : i32
    return %c0_i32, %c0_i32_0 : i32, i32
  }
  func.func @transform_1(%arg0: i32) -> (i32, i32) {
    %c0_i32 = arith.constant 0 : i32
    %c0_i32_0 = arith.constant 0 : i32
    %c0_i32_1 = arith.constant 0 : i32
    return %c0_i32, %c0_i32_0 : i32, i32
  }
  func.func @transform_2(%arg0: i32) -> (i32, i32) {
    %c0_i32 = arith.constant 0 : i32
    %c0_i32_0 = arith.constant 0 : i32
    %c0_i32_1 = arith.constant 0 : i32
    return %c0_i32, %c0_i32_0 : i32, i32
  }
  func.func @transform_3(%arg0: i32) -> (i32, i32) {
    %c0_i32 = arith.constant 0 : i32
    %c0_i32_0 = arith.constant 0 : i32
    %c0_i32_1 = arith.constant 0 : i32
    return %c0_i32, %c0_i32_0 : i32, i32
  }
}

</mosaic_0001>

<bundles_post_ra>
// kernel: classify_forward.1
= control target key start
LH: loop header
LB: loop body
LE: loop exit
PB: predicated region body
PF: predicated region fallthrough
CT: control target
= control target key end

     0   :  { %vm152_vm0 = vcmask 392192   ;;  %vm362_vm1 = vcmask 130048   ;;  %v1310_v46 = vmov 0.0   ;;  %vm1311_vm2 = vmmov 0   ;;  %s1838_s1 = inlined_call_operand.vmem [shape: bf16[176,128], index: 1, kind: input, shape index: {}]   ;;  %s1839_s0 = inlined_call_operand.vmem [shape: bf16[256,48], index: 0, kind: input, shape index: {}]   ;;  %s1840_s2 = inlined_call_operand.vmem [shape: f32[8,128], index: 2, kind: input, shape index: {}]   ;;  %s1841_s3 = inlined_call_operand.vmem [shape: f32[8,128], index: 3, kind: output, shape index: {}]  }
   0x1   :  { %v1277_v0 = vld [vmem:[%s1838_s1] sm:$0xff]   ;;  %v1278_v1 = vld [vmem:[%s1838_s1 + $0x8] sm:$0xff]   ;;  %v1279_v3 = vld [vmem:[%s1838_s1 + $0x10] sm:$0xff]   ;;  %vm962_vm3 = vcmask 1043456   ;;  %vm981_vm4 = vcmask 195584   ;;  %vm1050_vm5 = vcmask 261120  }
   0x2   :  { %1191 = vmatprep.subr.bf16.mxu0 %v1277_v0  ;;  %1269 = vmatprep.subr.bf16.mxu1 %v1277_v0  ;;  %v1280_v2 = vld [vmem:[%s1839_s0] sm:$0xff]   ;;  %v1281_v4 = vld [vmem:[%s1839_s0 + $0x8] sm:$0xff]   ;;  %v1282_v5 = vld [vmem:[%s1839_s0 + $0x10] sm:$0xff]  }
   0x3   :  { %1192 = vmatpush3.bf16.msra.mxu0 %v1277_v0  ;;  %1272 = vmatpush3.bf16.msra.mxu1 %v1277_v0  ;;  %v1283_v6 = vld [vmem:[%s1839_s0 + $0x18] sm:$0xff]   ;;  %v1294_v7 = vld [vmem:[%s1839_s0 + $0x70] sm:$0xff]   ;;  %v1284_v9 = vld [vmem:[%s1839_s0 + $0x20] sm:$0xff]  }
   0x4   :  { %1193 = vmatprep.subr.bf16.mxu0 %v1278_v1  ;;  %1270 = vmatprep.subr.bf16.mxu1 %v1278_v1  ;;  %v1295_v8 = vld [vmem:[%s1839_s0 + $0x78] sm:$0xff]   ;;  %v1285_v10 = vld [vmem:[%s1839_s0 + $0x28] sm:$0xff]   ;;  %v1286_v11 = vld [vmem:[%s1839_s0 + $0x30] sm:$0xff]  }
   0x5   :  { %1197 = vmatprep.mubr.msk.bf16.mxu0 %vm152_vm0, %v1280_v2  ;;  %1225 = vmatprep.mubr.msk.bf16.mxu1 %vm152_vm0, %v1294_v7  ;;  %v1287_v12 = vld [vmem:[%s1839_s0 + $0x38] sm:$0xff]   ;;  %v1288_v13 = vld [vmem:[%s1839_s0 + $0x40] sm:$0xff]   ;;  %v1289_v14 = vld [vmem:[%s1839_s0 + $0x48] sm:$0xff]  }
   0x6   :  { %v1290_v15 = vld [vmem:[%s1839_s0 + $0x50] sm:$0xff]   ;;  %v1291_v16 = vld [vmem:[%s1839_s0 + $0x58] sm:$0xff]   ;;  %v1292_v17 = vld [vmem:[%s1839_s0 + $0x60] sm:$0xff]  }
   0x7   :  { %1194 = vmatpush3.bf16.msra.mxu0 %v1278_v1  ;;  %1273 = vmatpush3.bf16.msra.mxu1 %v1278_v1  ;;  %v1293_v18 = vld [vmem:[%s1839_s0 + $0x68] sm:$0xff]   ;;  %v1296_v41 = vld [vmem:[%s1838_s1 + $0x20] sm:$0xff]  }
   0x8   :  { %1195 = vmatprep.subr.bf16.mxu0 %v1279_v3  ;;  %1271 = vmatprep.subr.bf16.mxu1 %v1279_v3 }
   0xb   :  { %1196 = vmatpush3.bf16.msra.mxu0 %v1279_v3  ;;  %1274 = vmatpush3.bf16.msra.mxu1 %v1279_v3 }
   0xc   :  { %1229 = vmatprep.subr.bf16.mxu1 %v1310_v46 }
   0xe   :  { %1198 = vmatmul.mubr.msk.bf16.vlgmr.msra.gmra.mrb[0].mxu0 %vm152_vm0, %v1281_v4  ;;  %1226 = vmatmul.mubr.msk.bf16.vlgmr.msra.gmra.mrb[0].mxu1 %vm152_vm0, %v1295_v8 }
   0xf   :  { %1201 = vmatprep.mubr.msk.bf16.mxu0 %vm152_vm0, %v1282_v5  ;;  %1231 = vmatprep.mubr.msk.bf16.mxu1 %vm1311_vm2, %v1310_v46 }
  0x10   :  { %1230 = vmatpush3.bf16.msra.mxu1 %v1296_v41 }
  0x11   :  { %1235 = vmatprep.subr.bf16.mxu1 %v1310_v46 }
  0x16   :  { %1202 = vmatmul.mubr.msk.bf16.gmra.mrb[4].mxu0 %vm152_vm0, %v1283_v6 }
  0x17   :  { %1205 = vmatprep.mubr.msk.bf16.mxu0 %vm152_vm0, %v1284_v9 }
  0x1e   :  { %1206 = vmatmul.mubr.msk.bf16.gmra.mrb[8].mxu0 %vm152_vm0, %v1285_v10 }
  0x1f   :  { %1209 = vmatprep.mubr.msk.bf16.mxu0 %vm152_vm0, %v1286_v11 }
  0x26   :  { %1210 = vmatmul.mubr.msk.bf16.gmra.mrb[12].mxu0 %vm152_vm0, %v1287_v12 }
  0x27   :  { %1213 = vmatprep.mubr.msk.bf16.mxu0 %vm152_vm0, %v1288_v13 }
  0x2e   :  { %1214 = vmatmul.mubr.msk.bf16.gmra.mrb[16].mxu0 %vm152_vm0, %v1289_v14 }
  0x2f   :  { %1217 = vmatprep.mubr.msk.bf16.mxu0 %vm152_vm0, %v1290_v15 }
  0x36   :  { %1218 = vmatmul.mubr.msk.bf16.gmra.mrb[20].mxu0 %vm152_vm0, %v1291_v16 }
  0x37   :  { %1221 = vmatprep.mubr.msk.bf16.mxu0 %vm152_vm0, %v1292_v17 }
  0x3e   :  { %1222 = vmatmul.mubr.msk.bf16.gmra.mrb[24].mxu0 %vm152_vm0, %v1293_v18 }
  0xe1   :  { %v1405_v19 = vpop.f32.mrb[0].mxu0  ;;  %v1429_v33 = vpop.f32.mrb[0].mxu1 }
  0xe2   :  { %v1407_v20 = vpop.f32.mrb[1].mxu0  ;;  %v435_v23 = vmul.f32 %v1405_v19, %v1405_v19  ;;  %v366_v29 = vsel %vm362_vm1, %v1405_v19, 0.0  ;;  %v1432_v37 = vpop.f32.mrb[1].mxu1 }
  0xe3   :  { %v433_v21 = vmul.f32 %v1407_v20, %v1407_v20  ;;  %v1411_v22 = vpop.f32.mrb[2].mxu0  ;;  %v363_v25 = vsel %vm362_vm1, %v1407_v20, 0.0  ;;  %v1438_v40 = vpop.f32.mrb[2].mxu1 }
  0xe4   :  { %v1415_v24 = vpop.f32.mrb[3].mxu0  ;;  %v436_v31 = vmul.f32 %v1411_v22, %v1411_v22  ;;  %v468_v34 = vsel %vm362_vm1, %v435_v23, 0.0  ;;  %v368_v38 = vsel %vm362_vm1, %v1411_v22, 0.0  ;;  %v1445_v45 = vpop.f32.mrb[3].mxu1 }
  0xe5   :  { %v364_v26 = vsel %vm362_vm1, %v1415_v24, 0.0  ;;  %v434_v27 = vmul.f32 %v1415_v24, %v1415_v24  ;;  %v465_v30 = vsel %vm362_vm1, %v433_v21, 0.0 }
  0xe6   :  { %v365_v28 = vadd.f32 %v364_v26, %v363_v25  ;;  %v470_v47 = vsel %vm362_vm1, %v436_v31, 0.0 }
  0xe7   :  { %v466_v32 = vsel %vm362_vm1, %v434_v27, 0.0 }
  0xe8   :  { %v367_v35 = vadd.f32 %v366_v29, %v365_v28  ;;  %v467_v36 = vadd.f32 %v466_v32, %v465_v30 }
  0xe9   :  { %v1436_v39 = vpop.f32.mrb[4].mxu0 }
  0xea   :  { %v469_v42 = vadd.f32 %v468_v34, %v467_v36  ;;  %v1443_v43 = vpop.f32.mrb[5].mxu0  ;;  %v369_v44 = vadd.f32 %v368_v38, %v367_v35  ;;  %v439_v54 = vmul.f32 %v1436_v39, %v1436_v39  ;;  %v374_v60 = vsel %vm362_vm1, %v1436_v39, 0.0 }
  0xeb   :  { %v370_v48 = vsel %vm362_vm1, %v1443_v43, 0.0  ;;  %v437_v49 = vmul.f32 %v1443_v43, %v1443_v43  ;;  %v1455_v50 = vpop.f32.mrb[6].mxu0 }
  0xec   :  { %v371_v51 = vadd.f32 %v370_v48, %v369_v44  ;;  %v471_v52 = vadd.f32 %v470_v47, %v469_v42  ;;  %v1457_v53 = vpop.f32.mrb[7].mxu0  ;;  %v440_v61 = vmul.f32 %v1455_v50, %v1455_v50  ;;  %v476_v1 = vsel %vm362_vm1, %v439_v54, 0.0 }
  0xed   :  { %v472_v55 = vsel %vm362_vm1, %v437_v49, 0.0  ;;  %v372_v56 = vsel %vm362_vm1, %v1457_v53, 0.0  ;;  %v438_v57 = vmul.f32 %v1457_v53, %v1457_v53  ;;  %v376_v2 = vsel %vm362_vm1, %v1455_v50, 0.0 }
  0xee   :  { %v473_v58 = vadd.f32 %v472_v55, %v471_v52  ;;  %v373_v59 = vadd.f32 %v372_v56, %v371_v51  ;;  %v478_v7 = vsel %vm362_vm1, %v440_v61, 0.0 }
  0xef   :  { %v474_v62 = vsel %vm362_vm1, %v438_v57, 0.0 }
  0xf0   :  { %v375_v63 = vadd.f32 %v374_v60, %v373_v59  ;;  %v475_v0 = vadd.f32 %v474_v62, %v473_v58 }
  0xf1   :  { %v1475_v3 = vpop.f32.mrb[8].mxu0 }
  0xf2   :  { %v477_v4 = vadd.f32 %v476_v1, %v475_v0  ;;  %v1477_v5 = vpop.f32.mrb[9].mxu0  ;;  %v377_v6 = vadd.f32 %v376_v2, %v375_v63  ;;  %v443_v14 = vmul.f32 %v1475_v3, %v1475_v3  ;;  %v382_v23 = vsel %vm362_vm1, %v1475_v3, 0.0 }
  0xf3   :  { %v378_v8 = vsel %vm362_vm1, %v1477_v5, 0.0  ;;  %v441_v9 = vmul.f32 %v1477_v5, %v1477_v5  ;;  %v1484_v10 = vpop.f32.mrb[10].mxu0 }
  0xf4   :  { %v379_v11 = vadd.f32 %v378_v8, %v377_v6  ;;  %v479_v12 = vadd.f32 %v478_v7, %v477_v4  ;;  %v1486_v13 = vpop.f32.mrb[11].mxu0  ;;  %v444_v25 = vmul.f32 %v1484_v10, %v1484_v10  ;;  %v484_v29 = vsel %vm362_vm1, %v443_v14, 0.0 }
  0xf5   :  { %v480_v15 = vsel %vm362_vm1, %v441_v9, 0.0  ;;  %v380_v16 = vsel %vm362_vm1, %v1486_v13, 0.0  ;;  %v442_v17 = vmul.f32 %v1486_v13, %v1486_v13  ;;  %v384_v30 = vsel %vm362_vm1, %v1484_v10, 0.0 }
  0xf6   :  { %v481_v18 = vadd.f32 %v480_v15, %v479_v12  ;;  %v381_v21 = vadd.f32 %v380_v16, %v379_v11  ;;  %v486_v36 = vsel %vm362_vm1, %v444_v25, 0.0 }
  0xf7   :  { %v482_v26 = vsel %vm362_vm1, %v442_v17, 0.0 }
  0xf8   :  { %v383_v27 = vadd.f32 %v382_v23, %v381_v21  ;;  %v483_v28 = vadd.f32 %v482_v26, %v481_v18 }
  0xf9   :  { %v1503_v31 = vpop.f32.mrb[12].mxu0 }
  0xfa   :  { %v485_v32 = vadd.f32 %v484_v29, %v483_v28  ;;  %v1505_v34 = vpop.f32.mrb[13].mxu0  ;;  %v385_v35 = vadd.f32 %v384_v30, %v383_v27  ;;  %v447_v49 = vmul.f32 %v1503_v31, %v1503_v31  ;;  %v390_v57 = vsel %vm362_vm1, %v1503_v31, 0.0 }
  0xfb   :  { %v386_v38 = vsel %vm362_vm1, %v1505_v34, 0.0  ;;  %v445_v41 = vmul.f32 %v1505_v34, %v1505_v34  ;;  %v1512_v42 = vpop.f32.mrb[14].mxu0 }
  0xfc   :  { %v387_v44 = vadd.f32 %v386_v38, %v385_v35  ;;  %v487_v47 = vadd.f32 %v486_v36, %v485_v32  ;;  %v1514_v48 = vpop.f32.mrb[15].mxu0  ;;  %v448_v58 = vmul.f32 %v1512_v42, %v1512_v42  ;;  %v492_v62 = vsel %vm362_vm1, %v447_v49, 0.0 }
  0xfd   :  { %v488_v51 = vsel %vm362_vm1, %v445_v41, 0.0  ;;  %v388_v52 = vsel %vm362_vm1, %v1514_v48, 0.0  ;;  %v446_v54 = vmul.f32 %v1514_v48, %v1514_v48  ;;  %v392_v63 = vsel %vm362_vm1, %v1512_v42, 0.0 }
  0xfe   :  { %v489_v55 = vadd.f32 %v488_v51, %v487_v47  ;;  %v389_v56 = vadd.f32 %v388_v52, %v387_v44  ;;  %v494_v6 = vsel %vm362_vm1, %v448_v58, 0.0 }
  0xff   :  { %v490_v59 = vsel %vm362_vm1, %v446_v54, 0.0 }
 0x100   :  { %v391_v60 = vadd.f32 %v390_v57, %v389_v56  ;;  %v491_v61 = vadd.f32 %v490_v59, %v489_v55 }
 0x101   :  { %v1531_v0 = vpop.f32.mrb[16].mxu0 }
 0x102   :  { %v493_v1 = vadd.f32 %v492_v62, %v491_v61  ;;  %v1533_v2 = vpop.f32.mrb[17].mxu0  ;;  %v393_v4 = vadd.f32 %v392_v63, %v391_v60  ;;  %v451_v15 = vmul.f32 %v1531_v0, %v1531_v0  ;;  %v398_v25 = vsel %vm362_vm1, %v1531_v0, 0.0 }
 0x103   :  { %v394_v7 = vsel %vm362_vm1, %v1533_v2, 0.0  ;;  %v449_v8 = vmul.f32 %v1533_v2, %v1533_v2  ;;  %v1540_v9 = vpop.f32.mrb[18].mxu0 }
 0x104   :  { %v395_v11 = vadd.f32 %v394_v7, %v393_v4  ;;  %v495_v12 = vadd.f32 %v494_v6, %v493_v1  ;;  %v1542_v14 = vpop.f32.mrb[19].mxu0  ;;  %v452_v26 = vmul.f32 %v1540_v9, %v1540_v9  ;;  %v500_v30 = vsel %vm362_vm1, %v451_v15, 0.0 }
 0x105   :  { %v496_v16 = vsel %vm362_vm1, %v449_v8, 0.0  ;;  %v396_v17 = vsel %vm362_vm1, %v1542_v14, 0.0  ;;  %v450_v18 = vmul.f32 %v1542_v14, %v1542_v14  ;;  %v400_v32 = vsel %vm362_vm1, %v1540_v9, 0.0 }
 0x106   :  { %v497_v21 = vadd.f32 %v496_v16, %v495_v12  ;;  %v397_v23 = vadd.f32 %v396_v17, %v395_v11  ;;  %v502_v44 = vsel %vm362_vm1, %v452_v26, 0.0 }
 0x107   :  { %v498_v27 = vsel %vm362_vm1, %v450_v18, 0.0 }
 0x108   :  { %v399_v28 = vadd.f32 %v398_v25, %v397_v23  ;;  %v499_v29 = vadd.f32 %v498_v27, %v497_v21 }
 0x109   :  { %v1559_v35 = vpop.f32.mrb[20].mxu0 }
 0x10a   :  { %v501_v36 = vadd.f32 %v500_v30, %v499_v29  ;;  %v1561_v38 = vpop.f32.mrb[21].mxu0  ;;  %v401_v41 = vadd.f32 %v400_v32, %v399_v28  ;;  %v455_v56 = vmul.f32 %v1559_v35, %v1559_v35  ;;  %v406_v62 = vsel %vm362_vm1, %v1559_v35, 0.0 }
 0x10b   :  { %v402_v47 = vsel %vm362_vm1, %v1561_v38, 0.0  ;;  %v453_v49 = vmul.f32 %v1561_v38, %v1561_v38  ;;  %v1568_v51 = vpop.f32.mrb[22].mxu0 }
 0x10c   :  { %v403_v52 = vadd.f32 %v402_v47, %v401_v41  ;;  %v503_v54 = vadd.f32 %v502_v44, %v501_v36  ;;  %v1570_v55 = vpop.f32.mrb[23].mxu0  ;;  %v456_v63 = vmul.f32 %v1568_v51, %v1568_v51  ;;  %v508_v7 = vsel %vm362_vm1, %v455_v56, 0.0 }
 0x10d   :  { %v504_v57 = vsel %vm362_vm1, %v453_v49, 0.0  ;;  %v404_v58 = vsel %vm362_vm1, %v1570_v55, 0.0  ;;  %v454_v59 = vmul.f32 %v1570_v55, %v1570_v55  ;;  %v408_v8 = vsel %vm362_vm1, %v1568_v51, 0.0 }
 0x10e   :  { %v505_v60 = vadd.f32 %v504_v57, %v503_v54  ;;  %v405_v61 = vadd.f32 %v404_v58, %v403_v52  ;;  %v510_v17 = vsel %vm362_vm1, %v456_v63, 0.0  ;;  %v461_v52 = vmul.f32 %v1432_v37, %v1432_v37 }
 0x10f   :  { %v506_v1 = vsel %vm362_vm1, %v454_v59, 0.0  ;;  %v418_v59 = vsel %vm362_vm1, %v1432_v37, 0.0 }
 0x110   :  { %v407_v4 = vadd.f32 %v406_v62, %v405_v61  ;;  %v507_v6 = vadd.f32 %v506_v1, %v505_v60  ;;  %v520_v63 = vsel %vm362_vm1, %v461_v52, 0.0  ;;  %v462_v1 = vmul.f32 %v1445_v45, %v1445_v45 }
 0x111   :  { %v1587_v11 = vpop.f32.mrb[24].mxu0 }
 0x112   :  { %v509_v12 = vadd.f32 %v508_v7, %v507_v6  ;;  %v1589_v15 = vpop.f32.mrb[25].mxu0  ;;  %v409_v16 = vadd.f32 %v408_v8, %v407_v4  ;;  %v459_v28 = vmul.f32 %v1587_v11, %v1587_v11  ;;  %v414_v44 = vsel %vm362_vm1, %v1587_v11, 0.0 }
 0x113   :  { %v410_v18 = vsel %vm362_vm1, %v1589_v15, 0.0  ;;  %v457_v21 = vmul.f32 %v1589_v15, %v1589_v15  ;;  %v1596_v23 = vpop.f32.mrb[26].mxu0  ;;  %v463_v7 = vmul.f32 %v1429_v33, %v1429_v33  ;;  %v420_v8 = vsel %vm362_vm1, %v1445_v45, 0.0 }
 0x114   :  { %v411_v25 = vadd.f32 %v410_v18, %v409_v16  ;;  %v511_v26 = vadd.f32 %v510_v17, %v509_v12  ;;  %v1598_v27 = vpop.f32.mrb[27].mxu0  ;;  %v460_v47 = vmul.f32 %v1596_v23, %v1596_v23  ;;  %v516_v57 = vsel %vm362_vm1, %v459_v28, 0.0 }
 0x115   :  { %v512_v29 = vsel %vm362_vm1, %v457_v21, 0.0  ;;  %v412_v30 = vsel %vm362_vm1, %v1598_v27, 0.0  ;;  %v458_v32 = vmul.f32 %v1598_v27, %v1598_v27  ;;  %v416_v58 = vsel %vm362_vm1, %v1596_v23, 0.0 }
 0x116   :  { %v513_v36 = vadd.f32 %v512_v29, %v511_v26  ;;  %v413_v41 = vadd.f32 %v412_v30, %v411_v25  ;;  %v518_v62 = vsel %vm362_vm1, %v460_v47, 0.0  ;;  %v422_v17 = vsel %vm362_vm1, %v1429_v33, 0.0 }
 0x117   :  { %v514_v49 = vsel %vm362_vm1, %v458_v32, 0.0  ;;  %v464_v18 = vmul.f32 %v1438_v40, %v1438_v40  ;;  %v522_v21 = vsel %vm362_vm1, %v462_v1, 0.0  ;;  %v524_v28 = vsel %vm362_vm1, %v463_v7, 0.0 }
 0x118   :  { %v415_v54 = vadd.f32 %v414_v44, %v413_v41  ;;  %v515_v56 = vadd.f32 %v514_v49, %v513_v36  ;;  %v424_v29 = vsel %vm362_vm1, %v1438_v40, 0.0  ;;  %v604_v1 = vlaneseq }
 0x119   :  { %v526_v36 = vsel %vm362_vm1, %v464_v18, 0.0 }
 0x11a   :  { %v517_v60 = vadd.f32 %v516_v57, %v515_v56  ;;  %v417_v61 = vadd.f32 %v416_v58, %v415_v54 }
 0x11c   :  { %v419_v4 = vadd.f32 %v418_v59, %v417_v61  ;;  %v519_v6 = vadd.f32 %v518_v62, %v517_v60 }
 0x11e   :  { %v521_v12 = vadd.f32 %v520_v63, %v519_v6  ;;  %v421_v16 = vadd.f32 %v420_v8, %v419_v4 }
 0x120   :  { %v423_v25 = vadd.f32 %v422_v17, %v421_v16  ;;  %v523_v26 = vadd.f32 %v522_v21, %v521_v12 }
 0x122   :  { %v425_v30 = vadd.f32 %v424_v29, %v423_v25  ;;  %v525_v32 = vadd.f32 %v524_v28, %v523_v26 }
 0x124   :  { %v426_v41 = vrot.slane %v425_v30, 4  ;;  %v527_v44 = vadd.f32 %v526_v36, %v525_v32 }
 0x126   :  { %v427_v47 = vadd.f32 %v426_v41, %v425_v30  ;;  %v528_v49 = vrot.slane %v527_v44, 4 }
 0x128   :  { %v428_v52 = vrot.slane %v427_v47, 2  ;;  %v529_v54 = vadd.f32 %v528_v49, %v527_v44 }
 0x12a   :  { %v429_v56 = vadd.f32 %v428_v52, %v427_v47  ;;  %v530_v57 = vrot.slane %v529_v54, 2 }
 0x12c   :  { %v430_v58 = vrot.slane %v429_v56, 1  ;;  %v531_v59 = vadd.f32 %v530_v57, %v529_v54 }
 0x12e   :  { %v431_v60 = vadd.f32 %v430_v58, %v429_v56  ;;  %v532_v61 = vrot.slane %v531_v59, 1 }
 0x130   :  { %v1636_v62 = vmul.f32 0.00390625, %v431_v60  ;;  %v533_v63 = vadd.f32 %v532_v61, %v531_v59 }
 0x132   :  { %v534_v4 = vmul.f32 0.00390625, %v533_v63  ;;  %v535_v6 = vmul.f32 %v1636_v62, %v1636_v62  ;;  %v551_v7 = vsub.f32 %v1514_v48, %v1636_v62  ;;  %v567_v8 = vsub.f32 %v1445_v45, %v1636_v62 }
 0x133   :  { %v538_v12 = vsub.f32 %v1407_v20, %v1636_v62  ;;  %v539_v16 = vsub.f32 %v1415_v24, %v1636_v62  ;;  %v540_v17 = vsub.f32 %v1405_v19, %v1636_v62  ;;  %v541_v18 = vsub.f32 %v1411_v22, %v1636_v62 }
 0x134   :  { %v536_v21 = vsub.f32 %v534_v4, %v535_v6  ;;  %v542_v25 = vsub.f32 %v1443_v43, %v1636_v62  ;;  %v543_v48 = vsub.f32 %v1457_v53, %v1636_v62  ;;  %v544_v45 = vsub.f32 %v1436_v39, %v1636_v62 }
 0x135   :  { %v545_v20 = vsub.f32 %v1455_v50, %v1636_v62  ;;  %v546_v24 = vsub.f32 %v1477_v5, %v1636_v62  ;;  %v547_v19 = vsub.f32 %v1486_v13, %v1636_v62  ;;  %v548_v22 = vsub.f32 %v1475_v3, %v1636_v62 }
 0x136   :  { %v537_v26 = vmax.f32 %v536_v21, 0.0  ;;  %v549_v43 = vsub.f32 %v1484_v10, %v1636_v62  ;;  %v550_v53 = vsub.f32 %v1505_v34, %v1636_v62  ;;  %v552_v39 = vsub.f32 %v1503_v31, %v1636_v62 }
 0x137   :  { %v553_v50 = vsub.f32 %v1512_v42, %v1636_v62  ;;  %v554_v5 = vsub.f32 %v1533_v2, %v1636_v62  ;;  %v555_v13 = vsub.f32 %v1542_v14, %v1636_v62  ;;  %v556_v3 = vsub.f32 %v1531_v0, %v1636_v62 }
 0x138   :  { %v570_v28 = vadd.f32 1e-05, %v537_v26  ;;  %v557_v10 = vsub.f32 %v1540_v9, %v1636_v62  ;;  %v558_v34 = vsub.f32 %v1561_v38, %v1636_v62  ;;  %v559_v31 = vsub.f32 %v1570_v55, %v1636_v62 }
 0x139   :  { %v560_v42 = vsub.f32 %v1559_v35, %v1636_v62  ;;  %v561_v2 = vsub.f32 %v1568_v51, %v1636_v62  ;;  %v562_v14 = vsub.f32 %v1589_v15, %v1636_v62  ;;  %v563_v0 = vsub.f32 %v1598_v27, %v1636_v62 }
 0x13a   :  { %1304 = vrsqrt.f32 %v570_v28  ;;  %v564_v9 = vsub.f32 %v1587_v11, %v1636_v62  ;;  %v565_v38 = vsub.f32 %v1596_v23, %v1636_v62  ;;  %v566_v55 = vsub.f32 %v1432_v37, %v1636_v62  ;;  %v1710_v11 = vld [vmem:[%s1840_s2] sm:$0xff] }
 0x13b   :  { %v1700_v35 = vshrl.u32 %v604_v1, 7  ;;  %v568_v51 = vsub.f32 %v1429_v33, %v1636_v62  ;;  %v569_v15 = vsub.f32 %v1438_v40, %v1636_v62 }
 0x13d   :  { %v606_v27 = vsub.s32 0, %v1700_v35  ;;  %v642_v23 = vsub.s32 1, %v1700_v35 }
 0x13f   :  { %v1714_v29 = vrot.slane %v1710_v11, %v606_v27  ;;  %v1717_v30 = vrot.slane %v1710_v11, %v642_v23 }
 0x144   :  { %v1305_v37 = vpop.eup %1304 }
 0x145   :  { %v585_v33 = vmul.f32 %v1305_v37, %v551_v7  ;;  %v601_v32 = vmul.f32 %v1305_v37, %v567_v8  ;;  %v572_v36 = vmul.f32 %v1305_v37, %v538_v12  ;;  %v573_v40 = vmul.f32 %v1305_v37, %v539_v16 }
 0x146   :  { %v574_v41 = vmul.f32 %v1305_v37, %v540_v17  ;;  %v575_v44 = vmul.f32 %v1305_v37, %v541_v18  ;;  %v576_v47 = vmul.f32 %v1305_v37, %v542_v25  ;;  %v577_v49 = vmul.f32 %v1305_v37, %v543_v48 }
 0x147   :  { %v621_v52 = vmul.f32 %v1714_v29, %v585_v33  ;;  %v637_v54 = vmul.f32 %v1714_v29, %v601_v32  ;;  %v578_v56 = vmul.f32 %v1305_v37, %v544_v45  ;;  %v579_v57 = vmul.f32 %v1305_v37, %v545_v20 }
 0x148   :  { %v580_v58 = vmul.f32 %v1305_v37, %v546_v24  ;;  %v581_v59 = vmul.f32 %v1305_v37, %v547_v19  ;;  %v582_v60 = vmul.f32 %v1305_v37, %v548_v22  ;;  %v583_v61 = vmul.f32 %v1305_v37, %v549_v43 }
 0x149   :  { %v657_v62 = vadd.f32 %v1717_v30, %v621_v52  ;;  %v673_v63 = vadd.f32 %v1717_v30, %v637_v54  ;;  %v584_v1 = vmul.f32 %v1305_v37, %v550_v53  ;;  %v586_v4 = vmul.f32 %v1305_v37, %v552_v39 }
 0x14a   :  { %v587_v6 = vmul.f32 %v1305_v37, %v553_v50  ;;  %v588_v7 = vmul.f32 %v1305_v37, %v554_v5  ;;  %v589_v8 = vmul.f32 %v1305_v37, %v555_v13  ;;  %v590_v12 = vmul.f32 %v1305_v37, %v556_v3 }
 0x14b   :  { %v689_v16 = vmax.f32 %v657_v62, 0.0  ;;  %v705_v17 = vmax.f32 %v673_v63, 0.0  ;;  %v591_v18 = vmul.f32 %v1305_v37, %v557_v10  ;;  %v592_v21 = vmul.f32 %v1305_v37, %v558_v34 }
 0x14c   :  { %v593_v25 = vmul.f32 %v1305_v37, %v559_v31  ;;  %v594_v48 = vmul.f32 %v1305_v37, %v560_v42  ;;  %v595_v45 = vmul.f32 %v1305_v37, %v561_v2  ;;  %v596_v20 = vmul.f32 %v1305_v37, %v562_v14 }
 0x14d   :  { %v1723_v24 = vmax.f32 %v689_v16, %v705_v17  ;;  %v597_v19 = vmul.f32 %v1305_v37, %v563_v0  ;;  %v598_v22 = vmul.f32 %v1305_v37, %v564_v9  ;;  %v599_v26 = vmul.f32 %v1305_v37, %v565_v38 }
 0x14e   :  { %v600_v43 = vmul.f32 %v1305_v37, %v566_v55  ;;  %v602_v53 = vmul.f32 %v1305_v37, %v568_v51  ;;  %v603_v39 = vmul.f32 %v1305_v37, %v569_v15  ;;  %v608_v50 = vmul.f32 %v1714_v29, %v572_v36 }
 0x14f   :  { %v609_v5 = vmul.f32 %v1714_v29, %v573_v40  ;;  %v610_v13 = vmul.f32 %v1714_v29, %v574_v41  ;;  %v611_v3 = vmul.f32 %v1714_v29, %v575_v44  ;;  %v612_v28 = vmul.f32 %v1714_v29, %v576_v47 }
 0x150   :  { %v613_v10 = vmul.f32 %v1714_v29, %v577_v49  ;;  %v614_v34 = vmul.f32 %v1714_v29, %v578_v56  ;;  %v615_v31 = vmul.f32 %v1714_v29, %v579_v57  ;;  %v616_v42 = vmul.f32 %v1714_v29, %v580_v58 }
 0x151   :  { %v617_v2 = vmul.f32 %v1714_v29, %v581_v59  ;;  %v618_v14 = vmul.f32 %v1714_v29, %v582_v60  ;;  %v619_v0 = vmul.f32 %v1714_v29, %v583_v61  ;;  %v620_v9 = vmul.f32 %v1714_v29, %v584_v1 }
 0x152   :  { %v622_v38 = vmul.f32 %v1714_v29, %v586_v4  ;;  %v623_v55 = vmul.f32 %v1714_v29, %v587_v6  ;;  %v624_v51 = vmul.f32 %v1714_v29, %v588_v7  ;;  %v625_v15 = vmul.f32 %v1714_v29, %v589_v8 }
 0x153   :  { %v626_v27 = vmul.f32 %v1714_v29, %v590_v12  ;;  %v627_v23 = vmul.f32 %v1714_v29, %v591_v18  ;;  %v628_v37 = vmul.f32 %v1714_v29, %v592_v21  ;;  %v629_v33 = vmul.f32 %v1714_v29, %v593_v25 }
 0x154   :  { %v630_v32 = vmul.f32 %v1714_v29, %v594_v48  ;;  %v631_v36 = vmul.f32 %v1714_v29, %v595_v45  ;;  %v632_v40 = vmul.f32 %v1714_v29, %v596_v20  ;;  %v633_v41 = vmul.f32 %v1714_v29, %v597_v19 }
 0x155   :  { %v634_v44 = vmul.f32 %v1714_v29, %v598_v22  ;;  %v635_v47 = vmul.f32 %v1714_v29, %v599_v26  ;;  %v636_v49 = vmul.f32 %v1714_v29, %v600_v43  ;;  %v638_v52 = vmul.f32 %v1714_v29, %v602_v53 }
 0x156   :  { %v639_v54 = vmul.f32 %v1714_v29, %v603_v39  ;;  %v644_v56 = vadd.f32 %v1717_v30, %v608_v50  ;;  %v645_v57 = vadd.f32 %v1717_v30, %v609_v5  ;;  %v646_v58 = vadd.f32 %v1717_v30, %v610_v13 }
 0x157   :  { %v647_v59 = vadd.f32 %v1717_v30, %v611_v3  ;;  %v648_v60 = vadd.f32 %v1717_v30, %v612_v28  ;;  %v649_v61 = vadd.f32 %v1717_v30, %v613_v10  ;;  %v650_v62 = vadd.f32 %v1717_v30, %v614_v34 }
 0x158   :  { %v651_v63 = vadd.f32 %v1717_v30, %v615_v31  ;;  %v652_v1 = vadd.f32 %v1717_v30, %v616_v42  ;;  %v653_v29 = vadd.f32 %v1717_v30, %v617_v2  ;;  %v654_v4 = vadd.f32 %v1717_v30, %v618_v14 }
 0x159   :  { %v655_v6 = vadd.f32 %v1717_v30, %v619_v0  ;;  %v656_v7 = vadd.f32 %v1717_v30, %v620_v9  ;;  %v658_v8 = vadd.f32 %v1717_v30, %v622_v38  ;;  %v659_v12 = vadd.f32 %v1717_v30, %v623_v55 }
 0x15a   :  { %v660_v16 = vadd.f32 %v1717_v30, %v624_v51  ;;  %v661_v17 = vadd.f32 %v1717_v30, %v625_v15  ;;  %v662_v18 = vadd.f32 %v1717_v30, %v626_v27  ;;  %v663_v21 = vadd.f32 %v1717_v30, %v627_v23 }
 0x15b   :  { %v664_v25 = vadd.f32 %v1717_v30, %v628_v37  ;;  %v665_v48 = vadd.f32 %v1717_v30, %v629_v33  ;;  %v666_v45 = vadd.f32 %v1717_v30, %v630_v32  ;;  %v667_v20 = vadd.f32 %v1717_v30, %v631_v36 }
 0x15c   :  { %v668_v19 = vadd.f32 %v1717_v30, %v632_v40  ;;  %v669_v22 = vadd.f32 %v1717_v30, %v633_v41  ;;  %v670_v26 = vadd.f32 %v1717_v30, %v634_v44  ;;  %v671_v43 = vadd.f32 %v1717_v30, %v635_v47 }
 0x15d   :  { %v672_v53 = vadd.f32 %v1717_v30, %v636_v49  ;;  %v674_v39 = vadd.f32 %v1717_v30, %v638_v52  ;;  %v675_v50 = vadd.f32 %v1717_v30, %v639_v54  ;;  %v676_v5 = vmax.f32 %v644_v56, 0.0 }
 0x15e   :  { %v677_v13 = vmax.f32 %v645_v57, 0.0  ;;  %v678_v3 = vmax.f32 %v646_v58, 0.0  ;;  %v679_v28 = vmax.f32 %v647_v59, 0.0  ;;  %v680_v10 = vmax.f32 %v648_v60, 0.0 }
 0x15f   :  { %v681_v34 = vmax.f32 %v649_v61, 0.0  ;;  %v682_v31 = vmax.f32 %v650_v62, 0.0  ;;  %v683_v42 = vmax.f32 %v651_v63, 0.0  ;;  %v684_v2 = vmax.f32 %v652_v1, 0.0 }
 0x160   :  { %v685_v14 = vmax.f32 %v653_v29, 0.0  ;;  %v686_v0 = vmax.f32 %v654_v4, 0.0  ;;  %v687_v9 = vmax.f32 %v655_v6, 0.0  ;;  %v688_v38 = vmax.f32 %v656_v7, 0.0 }
 0x161   :  { %v690_v55 = vmax.f32 %v658_v8, 0.0  ;;  %v691_v51 = vmax.f32 %v659_v12, 0.0  ;;  %v692_v15 = vmax.f32 %v660_v16, 0.0  ;;  %v693_v27 = vmax.f32 %v661_v17, 0.0 }
 0x162   :  { %v694_v23 = vmax.f32 %v662_v18, 0.0  ;;  %v695_v37 = vmax.f32 %v663_v21, 0.0  ;;  %v696_v30 = vmax.f32 %v664_v25, 0.0  ;;  %v697_v33 = vmax.f32 %v665_v48, 0.0 }
 0x163   :  { %v698_v32 = vmax.f32 %v666_v45, 0.0  ;;  %v699_v36 = vmax.f32 %v667_v20, 0.0  ;;  %v700_v40 = vmax.f32 %v668_v19, 0.0  ;;  %v701_v41 = vmax.f32 %v669_v22, 0.0  ;;  %v1297_v19 = vld [vmem:[%s1838_s1 + $0x30] sm:$0xff]  }
 0x164   :  { %v702_v44 = vmax.f32 %v670_v26, 0.0  ;;  %v703_v47 = vmax.f32 %v671_v43, 0.0  ;;  %v704_v49 = vmax.f32 %v672_v53, 0.0  ;;  %v706_v52 = vmax.f32 %v674_v39, 0.0  ;;  %v1299_v39 = vld [vmem:[%s1838_s1 + $0x28] sm:$0xff]  }
 0x165   :  { %v707_v54 = vmax.f32 %v675_v50, 0.0  ;;  %v708_v56 = vmax.f32 %v676_v5, %v692_v15  ;;  %v709_v57 = vmax.f32 %v677_v13, %v693_v27  ;;  %v710_v58 = vmax.f32 %v678_v3, %v694_v23  ;;  %v1300_v50 = vld [vmem:[%s1838_s1 + $0x48] sm:$0xff]   ;;  %v1301_v5 = vld [vmem:[%s1838_s1 + $0x50] ss:$0 sps:$4 sm:$0xff]  }
 0x166   :  { %v711_v59 = vmax.f32 %v679_v28, %v695_v37  ;;  %v712_v60 = vmax.f32 %v680_v10, %v696_v30  ;;  %v713_v61 = vmax.f32 %v681_v34, %v697_v33  ;;  %v714_v62 = vmax.f32 %v682_v31, %v698_v32 }
 0x167   :  { %v715_v63 = vmax.f32 %v683_v42, %v699_v36  ;;  %v716_v1 = vmax.f32 %v684_v2, %v700_v40  ;;  %v717_v29 = vmax.f32 %v685_v14, %v701_v41  ;;  %v718_v4 = vmax.f32 %v686_v0, %v702_v44 }
 0x168   :  { %v719_v6 = vmax.f32 %v687_v9, %v703_v47  ;;  %v720_v7 = vmax.f32 %v688_v38, %v704_v49  ;;  %v722_v8 = vmax.f32 %v690_v55, %v706_v52  ;;  %v723_v12 = vmax.f32 %v691_v51, %v707_v54 }
 0x169   :  { %v725_v16 = vmax.f32 %v709_v57, %v717_v29  ;;  %v726_v17 = vmax.f32 %v710_v58, %v718_v4  ;;  %v724_v18 = vmax.f32 %v708_v56, %v716_v1  ;;  %v729_v21 = vmax.f32 %v713_v61, %v1723_v24  ;;  %v1298_v24 = vld [vmem:[%s1838_s1 + $0x18] sm:$0xff]  }
 0x16a   :  { %v727_v25 = vmax.f32 %v711_v59, %v719_v6  ;;  %v730_v48 = vmax.f32 %v714_v62, %v722_v8  ;;  %v731_v45 = vmax.f32 %v715_v63, %v723_v12  ;;  %v728_v20 = vmax.f32 %v712_v60, %v720_v7  ;;  %v1302_v61 = vld [vmem:[%s1838_s1 + $0x38] sm:$0xff]   ;;  %v1303_v63 = vld [vmem:[%s1838_s1 + $0x40] sm:$0xff]  }
 0x16b   :  { %v732_v22 = vpack.c.bf16 %v725_v16, %v724_v18  ;;  %v986_v13 = vsel %vm962_vm3, %v1301_v5, 0  ;;  %v948_v27 = vsub.s32 2, %v1700_v35  ;;  %v970_v1 = vsub.s32 3, %v1700_v35 }
 0x16c   :  { %v733_v26 = vpack.c.bf16 %v727_v25, %v726_v17  ;;  %v735_v43 = vpack.c.bf16 %v731_v45, %v730_v48  ;;  %v734_v53 = vpack.c.bf16 %v729_v21, %v728_v20 }
 0x16d   :  { %v949_v30 = vrot.slane %v1710_v11, %v948_v27  ;;  %v971_v29 = vrot.slane %v1710_v11, %v970_v1 }
 0x16e   :  { %1232 = vmatmul.mubr.msk.bf16.vlgmr.msra.gmra.mrb[4].mxu1 %vm362_vm1, %v733_v26 }
 0x16f   :  { %1236 = vmatpush3.bf16.msra.mxu1 %v1297_v19  ;;  %1237 = vmatprep.mubr.msk.bf16.mxu1 %vm1311_vm2, %v1310_v46 }
 0x170   :  { %1241 = vmatprep.subr.bf16.mxu1 %v1310_v46 }
 0x176   :  { %1238 = vmatmul.mubr.msk.bf16.vlgmr.msra.gmra.mrb[8].mxu1 %vm362_vm1, %v735_v43 }
 0x177   :  { %1242 = vmatpush3.bf16.msra.mxu1 %v1298_v24  ;;  %1243 = vmatprep.mubr.msk.bf16.mxu1 %vm1311_vm2, %v1310_v46 }
 0x178   :  { %1247 = vmatprep.subr.bf16.mxu1 %v1310_v46 }
 0x17e   :  { %1244 = vmatmul.mubr.msk.bf16.vlgmr.msra.gmra.mrb[12].mxu1 %vm362_vm1, %v732_v22 }
 0x17f   :  { %1248 = vmatpush3.bf16.msra.mxu1 %v1299_v39  ;;  %1249 = vmatprep.mubr.msk.bf16.mxu1 %vm1311_vm2, %v1310_v46 }
 0x180   :  { %1253 = vmatprep.subr.bf16.mxu1 %v1310_v46 }
 0x186   :  { %1250 = vmatmul.mubr.msk.bf16.vlgmr.msra.gmra.mrb[16].mxu1 %vm362_vm1, %v734_v53 }
 0x187   :  { %1257 = vmatprep.mubr.msk.bf16.mxu1 %vm1311_vm2, %v1310_v46  ;;  %1254 = vmatpush3.bf16.msra.mxu1 %v1300_v50 }
 0x188   :  { %1255 = vmatprep.subr.bf16.mxu1 %v1310_v46 }
 0x18b   :  { %1256 = vmatpush3.bf16.msra.mxu1 %v986_v13 }
 0x18c   :  { %1261 = vmatprep.subr.bf16.mxu1 %v1310_v46 }
 0x241   :  { %v787_v3 = vpop.f32.mrb[4].mxu1 }
 0x242   :  { %v1233_v28 = vpop.f32.mrb[5].mxu1 }
 0x243   :  { %v790_v10 = vpop.f32.mrb[6].mxu1 }
 0x244   :  { %v1234_v34 = vpop.f32.mrb[7].mxu1 }
 0x249   :  { %v837_v31 = vpop.f32.mrb[8].mxu1 }
 0x24a   :  { %v1239_v42 = vpop.f32.mrb[9].mxu1 }
 0x24b   :  { %v840_v2 = vpop.f32.mrb[10].mxu1 }
 0x24c   :  { %v1240_v14 = vpop.f32.mrb[11].mxu1 }
 0x251   :  { %v887_v0 = vpop.f32.mrb[12].mxu1 }
 0x252   :  { %v888_v9 = vadd.f32 %v887_v0, %v787_v3  ;;  %v1245_v38 = vpop.f32.mrb[13].mxu1 }
 0x253   :  { %v890_v55 = vpop.f32.mrb[14].mxu1 }
 0x254   :  { %v891_v51 = vadd.f32 %v890_v55, %v790_v10  ;;  %v1246_v15 = vpop.f32.mrb[15].mxu1 }
 0x259   :  { %v937_v23 = vpop.f32.mrb[16].mxu1 }
 0x25a   :  { %v938_v37 = vadd.f32 %v937_v23, %v837_v31  ;;  %v1251_v33 = vpop.f32.mrb[17].mxu1 }
 0x25b   :  { %v940_v32 = vpop.f32.mrb[18].mxu1 }
 0x25c   :  { %v944_v36 = vadd.f32 %v938_v37, %v888_v9  ;;  %v941_v40 = vadd.f32 %v940_v32, %v840_v2  ;;  %v1252_v41 = vpop.f32.mrb[19].mxu1 }
 0x25e   :  { %v950_v44 = vadd.f32 %v949_v30, %v944_v36  ;;  %v945_v47 = vadd.f32 %v941_v40, %v891_v51 }
 0x260   :  { %v951_v49 = vadd.f32 %v949_v30, %v945_v47  ;;  %v952_v52 = vmax.f32 %v950_v44, 0.0 }
 0x262   :  { %v953_v54 = vmax.f32 %v951_v49, 0.0 }
 0x264   :  { %v954_v56 = vmax.f32 %v952_v52, %v953_v54 }
 0x266   :  { %v956_v57 = vrot.slane %v954_v56, 4 }
 0x268   :  { %v958_v58 = vmax.f32 %v954_v56, %v956_v57 }
 0x26a   :  { %v960_v59 = vrot.slane %v958_v58, 4 }
 0x26c   :  { %v963_v60 = vsel %vm962_vm3, %v958_v58, %v960_v59 }
 0x26d   :  { %v964_v62 = vpack.c.bf16 %v963_v60, %v963_v60 }
 0x26f   :  { %1258 = vmatmul.mubr.msk.bf16.vlgmr.msra.gmra.mrb[20].mxu1 %vm981_vm4, %v964_v62 }
 0x270   :  { %1262 = vmatpush3.bf16.msra.mxu1 %v1302_v61  ;;  %1265 = vmatprep.mubr.msk.bf16.mxu1 %vm1311_vm2, %v1310_v46 }
 0x271   :  { %1263 = vmatprep.subr.bf16.mxu1 %v1310_v46  ;;  %v1036_v46 = vsub.s32 4, %v1700_v35 }
 0x273   :  { %v1037_v18 = vrot.slane %v1710_v11, %v1036_v46 }
 0x274   :  { %1264 = vmatpush3.bf16.msra.mxu1 %v1303_v63 }
 0x342   :  { %v1022_v4 = vpop.f32.mrb[20].mxu1 }
 0x343   :  { %v1023_v6 = vadd.f32 %v1022_v4, %v971_v29  ;;  %v1259_v7 = vpop.f32.mrb[21].mxu1 }
 0x344   :  { %v1025_v8 = vpop.f32.mrb[22].mxu1 }
 0x345   :  { %v1028_v12 = vmax.f32 %v1023_v6, 0.0  ;;  %v1260_v16 = vpop.f32.mrb[23].mxu1 }
 0x347   :  { %v1029_v17 = vpack.c.bf16 %v1028_v12, %v1028_v12 }
 0x349   :  { %1266 = vmatmul.mubr.msk.bf16.vlgmr.msra.gmra.mrb[24].mxu1 %vm1050_vm5, %v1029_v17 }
 0x41c   :  { %v1088_v21 = vpop.f32.mrb[24].mxu1 }
 0x41d   :  { %v1089_v25 = vadd.f32 %v1088_v21, %v1037_v18  ;;  %v1267_v48 = vpop.f32.mrb[25].mxu1 }
 0x41e   :  { %v1091_v45 = vpop.f32.mrb[26].mxu1 }
 0x41f   :  { %1094 = vmax.xlane.f32.xlu0 %v1089_v25  ;;  %v1268_v20 = vpop.f32.mrb[27].mxu1 }
 0x4ac   :  { %v1095_v19 = vpop.xlane.xlu0 %1094 }
 0x4ad   :  { %v1096_v22 = vsub.f32 %v1089_v25, %v1095_v19 }
 0x4af   :  { %v1097_v26 = vmul.f32 1.442695, %v1096_v22 }
 0x4b1   :  { %1306 = vpow2.f32 %v1097_v26 }
 0x4bb   :  { %v1307_v43 = vpop.eup %1306 }
 0x4bc   :  { %1099 = vadd.xlane.f32.xlu0 %v1307_v43 }
 0x549   :  { %v1100_v53 = vpop.xlane.xlu0 %1099 }
 0x54a   :  { %1308 = vlog2.f32 %v1100_v53 }
 0x554   :  { %v1309_v24 = vpop.eup %1308 }
 0x555   :  { %v1102_v39 = vmul.f32 0.6931472, %v1309_v24 }
 0x557   :  { %v1103_v50 = vsub.f32 %v1096_v22, %v1102_v39 }
 0x559   :  { %1104 = vst [vmem:[%s1841_s3] sm:$0xff] %v1103_v50 }

</bundles_post_ra>
